<compile_context>
chip_gen: v7x
topology: tpu7x:2x2x1
jax: 0.10.0
libtpu: 0.0.40
codegen_flags: <defaults>
</compile_context>

<pallas_src>
import functools

import jax
import jax.numpy as jnp
from jax.experimental import pallas as pl
from jax.experimental.pallas import tpu as pltpu


# Tile budget. Worst case VMEM: 2*(TM*TK + TK*TN + TM*TN)*2B + TM*TN*4B < 3 MiB,
# comfortably under the default scoped-VMEM limits of v5e (16 MiB), v6e (32 MiB)
# and v7x (32 of 64 MiB), so no vmem_limit override is needed. For very large
# production layers TM could be raised to 512 on v6e (128 MiB VMEM); keep the
# conservative value so the same kernel fits v7x's 64 MiB.
_TM_MAX = 256   # im2col patch rows per tile
_TK_MAX = 512   # contraction (Cin*k*k) tile
_TN_MAX = 512   # output-channel tile (multiple of 128 -> lane-dense stores)


def _round_up(x, m):
    return (x + m - 1) // m * m


# ----------------------------- Pallas kernel ---------------------------------
def _matmul_bn_lrelu_kernel(a_ref, w_ref, shift_ref, o_ref, acc_ref):
    """One (tm, tn) output tile, accumulated over the K grid axis.

    a_ref:     (tm, tk)  bf16 im2col patch rows
    w_ref:     (tk, tn)  bf16 conv weights with the BN scale pre-folded
    shift_ref: (1,  tn)  f32  folded conv-bias + BN shift
    o_ref:     (tm, tn)  bf16 output tile
    acc_ref:   (tm, tn)  f32  VMEM accumulator scratch
    """
    @pl.when(pl.program_id(2) == 0)
    def _init():
        acc_ref[...] = jnp.zeros_like(acc_ref)

    acc_ref[...] += jnp.dot(a_ref[...], w_ref[...],
                            preferred_element_type=jnp.float32)

    @pl.when(pl.program_id(2) == pl.num_programs(2) - 1)
    def _finalize():
        y = acc_ref[...] + shift_ref[...]
        o_ref[...] = jnp.where(y > 0, y, 0.1 * y).astype(o_ref.dtype)


def _fused_conv_matmul(patches, w_folded, shift, out_dtype=jnp.bfloat16):
    """patches:(M,K), w_folded:(K,C), shift:(C,)  ->  (M, C) in out_dtype."""
    M, K = patches.shape
    Kw, C = w_folded.shape
    assert K == Kw

    tm = min(_TM_MAX, _round_up(M, 16))
    tk = min(_TK_MAX, _round_up(K, 128))
    tn = min(_TN_MAX, _round_up(C, 128))
    Mp, Kp, Cp = _round_up(M, tm), _round_up(K, tk), _round_up(C, tn)

    a = patches.astype(jnp.bfloat16)
    if (Mp, Kp) != (M, K):
        a = jnp.pad(a, ((0, Mp - M), (0, Kp - K)))
    w = w_folded.astype(jnp.bfloat16)
    if (Kp, Cp) != (K, C):
        w = jnp.pad(w, ((0, Kp - K), (0, Cp - C)))
    sh = shift.reshape(1, C).astype(jnp.float32)
    if Cp != C:
        sh = jnp.pad(sh, ((0, 0), (0, Cp - C)))

    grid = (Mp // tm, Cp // tn, Kp // tk)
    cost = pl.CostEstimate(
        flops=2 * Mp * Kp * Cp,
        transcendentals=0,
        bytes_accessed=a.size * 2 + w.size * 2 + sh.size * 4 + Mp * Cp * 2)

    out = pl.pallas_call(
        _matmul_bn_lrelu_kernel,
        out_shape=jax.ShapeDtypeStruct((Mp, Cp), out_dtype),
        grid_spec=pltpu.PrefetchScalarGridSpec(
            num_scalar_prefetch=0,
            grid=grid,
            in_specs=[
                pl.BlockSpec((tm, tk), lambda i, j, k: (i, k)),   # patches
                pl.BlockSpec((tk, tn), lambda i, j, k: (k, j)),   # folded weights
                pl.BlockSpec((1, tn), lambda i, j, k: (0, j)),    # BN shift
            ],
            out_specs=pl.BlockSpec((tm, tn), lambda i, j, k: (i, j)),
            scratch_shapes=[pltpu.VMEM((tm, tn), jnp.float32)],
        ),
        compiler_params=pltpu.CompilerParams(
            dimension_semantics=("parallel", "parallel", "arbitrary")),
        cost_estimate=cost,
    )(a, w, sh)
    return out[:M, :C]


# ------------------------------ JAX glue (NHWC) -------------------------------
def _im2col_nhwc(x, k, s, p):
    """x: (N, H, W, C) -> (N*Ho*Wo, k*k*C) patches (kh-major, kw, c order)."""
    N, H, W, C = x.shape
    if p > 0:
        x = jnp.pad(x, ((0, 0), (p, p), (p, p), (0, 0)))
    Ho = (H + 2 * p - k) // s + 1
    Wo = (W + 2 * p - k) // s + 1
    cols = []
    for i in range(k):
        for j in range(k):
            cols.append(x[:, i:i + s * Ho:s, j:j + s * Wo:s, :])  # (N,Ho,Wo,C)
    patches = jnp.concatenate(cols, axis=-1).reshape(N * Ho * Wo, k * k * C)
    return patches, Ho, Wo


@functools.partial(jax.jit, static_argnames=("k", "s", "p"))
def conv_block(x_nhwc, weight, bias, gamma, beta, running_mean, running_var,
               *, k, s, p, eps=1e-5):
    """Conv2d(c_in,c_out,k,s,p) + BatchNorm2d(eval) + LeakyReLU(0.1), NHWC/bf16."""
    N, H, W, C_in = x_nhwc.shape
    C_out = weight.shape[0]

    patches, Ho, Wo = _im2col_nhwc(x_nhwc.astype(jnp.bfloat16), k, s, p)

    inv_std = (gamma / jnp.sqrt(running_var + eps)).astype(jnp.float32)   # (Cout,)
    # Fold the BN scale into the weights once per layer (wrapper-side, tiny op).
    w_hwio = jnp.transpose(weight.astype(jnp.float32), (2, 3, 1, 0))      # (k,k,Cin,Cout)
    w_folded = w_hwio.reshape(k * k * C_in, C_out) * inv_std[None, :]
    shift = (bias.astype(jnp.float32) - running_mean) * inv_std + beta    # (Cout,)

    y = _fused_conv_matmul(patches, w_folded, shift)                      # (M, Cout) bf16
    return y.reshape(N, Ho, Wo, C_out)


@functools.partial(jax.jit, static_argnames=("k", "s", "p"))
def conv_block_ref(x_nhwc, weight, bias, gamma, beta, running_mean, running_var,
                   *, k, s, p, eps=1e-5):
    """bf16-matched reference (lax.conv) for per-block numerical validation."""
    inv_std = gamma / jnp.sqrt(running_var + eps)
    w_hwio = jnp.transpose(weight, (2, 3, 1, 0)) * inv_std               # (k,k,Cin,Cout)
    shift = (bias - running_mean) * inv_std + beta
    y = jax.lax.conv_general_dilated(
        x_nhwc.astype(jnp.bfloat16), w_hwio.astype(jnp.bfloat16),
        window_strides=(s, s), padding=[(p, p), (p, p)],
        dimension_numbers=("NHWC", "HWIO", "NHWC"),
        preferred_element_type=jnp.float32)
    y = y + shift.reshape(1, 1, 1, -1)
    y = jnp.where(y > 0, y, 0.1 * y)
    return y.astype(jnp.bfloat16)


# --------------------------- Darknet53 (parameters) ----------------------------
def _init_conv(key, c_in, c_out, k, s, p):
    ks = jax.random.split(key, 6)
    fan_in = c_in * k * k
    return {
        "weight": jax.random.normal(ks[0], (c_out, c_in, k, k), jnp.float32)
                  / jnp.sqrt(float(fan_in)),
        "bias": 0.05 * jax.random.normal(ks[1], (c_out,), jnp.float32),
        "gamma": 1.0 + 0.1 * jax.random.normal(ks[2], (c_out,), jnp.float32),
        "beta": 0.05 * jax.random.normal(ks[3], (c_out,), jnp.float32),
        "mean": 0.05 * jax.random.normal(ks[4], (c_out,), jnp.float32),
        "var": jnp.abs(1.0 + 0.1 * jax.random.normal(ks[5], (c_out,), jnp.float32)),
        "k": k, "s": s, "p": p,
    }


def _apply_conv(cp, x, block_fn=conv_block):
    return block_fn(x, cp["weight"], cp["bias"], cp["gamma"], cp["beta"],
                    cp["mean"], cp["var"], k=cp["k"], s=cp["s"], p=cp["p"])


def init_darknet53(key):
    spec = []
    spec.append(("conv", (3, 32, 3, 1, 1)))
    spec.append(("conv", (32, 64, 3, 2, 1)))
    spec.append(("res", (64,)))
    spec.append(("conv", (64, 128, 3, 2, 1)))
    spec += [("res", (128,))] * 2
    spec.append(("conv", (128, 256, 3, 2, 1)))
    spec += [("res", (256,))] * 8
    spec.append(("tap", "conv11_26"))
    spec.append(("conv", (256, 512, 3, 2, 1)))
    spec += [("res", (512,))] * 8
    spec.append(("tap", "conv28_43"))
    spec.append(("conv", (512, 1024, 3, 2, 1)))
    spec += [("res", (1024,))] * 4
    spec.append(("tap", "conv45_52"))

    keys = jax.random.split(key, len(spec))
    params = []
    for (kind, payload), kk in zip(spec, keys):
        if kind == "conv":
            params.append(("conv", _init_conv(kk, *payload)))
        elif kind == "res":
            c = payload[0]
            k1, k2 = jax.random.split(kk)
            params.append(("res", (_init_conv(k1, c, c // 2, 1, 1, 0),
                                   _init_conv(k2, c // 2, c, 3, 1, 1))))
        else:
            params.append(("tap", payload))
    return params


def darknet53_forward(params, x_nchw):
    """Matches Darknet53.forward: returns (conv45_52, conv28_43, conv11_26) in NCHW."""
    x = jnp.transpose(x_nchw, (0, 2, 3, 1)).astype(jnp.bfloat16)   # NHWC, bf16
    taps = {}
    for kind, payload in params:
        if kind == "conv":
            x = _apply_conv(payload, x)
        elif kind == "res":
            p1, p2 = payload
            x = x + _apply_conv(p2, _apply_conv(p1, x))
        else:
            taps[payload] = x
    to_nchw = lambda t: jnp.transpose(t, (0, 3, 1, 2)).astype(jnp.float32)
    return (to_nchw(taps["conv45_52"]),
            to_nchw(taps["conv28_43"]),
            to_nchw(taps["conv11_26"]))


# -------------------------------- main -----------------------------------------
if __name__ == "__main__":
    key = jax.random.PRNGKey(0)
    k_params, k_x = jax.random.split(key)
    params = init_darknet53(k_params)

    N, H, W = 2, 32, 32
    x = jax.random.normal(k_x, (N, 3, H, W), jnp.float32)

    # ---- per-block numerical check of the fused Pallas kernel -----------------
    x_nhwc = jnp.transpose(x, (0, 2, 3, 1)).astype(jnp.bfloat16)
    cp1 = params[0][1]        # 3 -> 32,   3x3, s=1  (small K, small Cout)
    cp2 = params[1][1]        # 32 -> 64,  3x3, s=2  (strided)
    cp3 = params[2][1][0]     # 64 -> 32,  1x1, s=1  (pointwise, residual branch)

    y1 = _apply_conv(cp1, x_nhwc)
    y2 = _apply_conv(cp2, y1)
    y3 = _apply_conv(cp3, y2)
    checks = [
        (y1, _apply_conv(cp1, x_nhwc, block_fn=conv_block_ref)),
        (y2, _apply_conv(cp2, y1, block_fn=conv_block_ref)),
        (y3, _apply_conv(cp3, y2, block_fn=conv_block_ref)),
    ]
    for got, ref in checks:
        g = got.astype(jnp.float32)
        r = ref.astype(jnp.float32)
        assert g.shape == r.shape, (g.shape, r.shape)
        assert jnp.allclose(g, r, atol=2e-2, rtol=2e-2), \
            float(jnp.max(jnp.abs(g - r)))

    # ---- full Darknet53 forward ------------------------------------------------
    outs = jax.block_until_ready(darknet53_forward(params, x))
    c45_52, c28_43, c11_26 = outs
    assert c45_52.shape == (N, 1024, 1, 1), c45_52.shape
    assert c28_43.shape == (N, 512, 2, 2), c28_43.shape
    assert c11_26.shape == (N, 256, 4, 4), c11_26.shape
    for t in (c45_52, c28_43, c11_26):
        assert bool(jnp.all(jnp.isfinite(t)))

    print("KERNEL_OK")
</pallas_src>

<mosaic_0001>
module attributes {stable_mosaic.version = 11 : i64} {
  func.func @_matmul_bn_lrelu_kernel(%arg0: i32, %arg1: i32, %arg2: i32, %arg3: memref<256x128xbf16, #tpu.memory_space<vmem>>, %arg4: memref<128x128xbf16, #tpu.memory_space<vmem>>, %arg5: memref<1x128xf32, #tpu.memory_space<vmem>>, %arg6: memref<256x128xbf16, #tpu.memory_space<vmem>>, %arg7: memref<256x128xf32, #tpu.memory_space<vmem>>) attributes {dimension_semantics = [#tpu.dimension_semantics<parallel>, #tpu.dimension_semantics<parallel>, #tpu.dimension_semantics<arbitrary>], iteration_bounds = array<i64: 8, 1, 1>, scalar_prefetch = 0 : i64, scratch_operands = 1 : i64, tpu.core_type = #tpu.core_type<tc>, window_params = [{transform_indices = @transform_0, window_bounds = array<i64: 256, 128>}, {transform_indices = @transform_1, window_bounds = array<i64: 128, 128>}, {transform_indices = @transform_2, window_bounds = array<i64: 1, 128>}, {transform_indices = @transform_3, window_bounds = array<i64: 256, 128>}]} {
    %c0_i32 = arith.constant 0 : i32
    %0 = arith.cmpi eq, %arg2, %c0_i32 : i32
    %1 = arith.extui %0 : i1 to i32
    %c0_i32_0 = arith.constant 0 : i32
    %2 = arith.cmpi ne, %1, %c0_i32_0 : i32
    scf.if %2 {
      %cst_10 = arith.constant 0.000000e+00 : f32
      %12 = vector.broadcast %cst_10 : f32 to vector<256x128xf32>
      %c0_11 = arith.constant 0 : index
      %c0_12 = arith.constant 0 : index
      %13 = vector.load %arg7[%c0_11, %c0_12] : memref<256x128xf32, #tpu.memory_space<vmem>>, vector<256x128xf32>
      tpu.vector_store %arg7[%c0_11, %c0_12], %12 {strides = array<i32>} : memref<256x128xf32, #tpu.memory_space<vmem>>, vector<256x128xf32>,
    } else {
    }
    %c0 = arith.constant 0 : index
    %c0_1 = arith.constant 0 : index
    %3 = vector.load %arg7[%c0, %c0_1] : memref<256x128xf32, #tpu.memory_space<vmem>>, vector<256x128xf32>
    %c0_2 = arith.constant 0 : index
    %c0_3 = arith.constant 0 : index
    %4 = vector.load %arg3[%c0_2, %c0_3] : memref<256x128xbf16, #tpu.memory_space<vmem>>, vector<256x128xbf16>
    %c0_4 = arith.constant 0 : index
    %c0_5 = arith.constant 0 : index
    %5 = vector.load %arg4[%c0_4, %c0_5] : memref<128x128xbf16, #tpu.memory_space<vmem>>, vector<128x128xbf16>
    %cst = arith.constant dense<0.000000e+00> : vector<256x128xf32>
    %6 = tpu.matmul %4, %5, %cst {dimension_numbers = #tpu.dot_dimension_numbers<[1], [0], [0], [1], [0, 0, 1, 1], [], []>} : vector<256x128xbf16>, vector<128x128xbf16>, vector<256x128xf32> -> vector<256x128xf32>
    %7 = arith.addf %3, %6 : vector<256x128xf32>
    %c0_6 = arith.constant 0 : index
    %c0_7 = arith.constant 0 : index
    %8 = vector.load %arg7[%c0_6, %c0_7] : memref<256x128xf32, #tpu.memory_space<vmem>>, vector<256x128xf32>
    tpu.vector_store %arg7[%c0_6, %c0_7], %7 {strides = array<i32>} : memref<256x128xf32, #tpu.memory_space<vmem>>, vector<256x128xf32>,
    %c0_i32_8 = arith.constant 0 : i32
    %9 = arith.cmpi eq, %arg2, %c0_i32_8 : i32
    %10 = arith.extui %9 : i1 to i32
    %c0_i32_9 = arith.constant 0 : i32
    %11 = arith.cmpi ne, %10, %c0_i32_9 : i32
    scf.if %11 {
      %c0_10 = arith.constant 0 : index
      %c0_11 = arith.constant 0 : index
      %12 = vector.load %arg7[%c0_10, %c0_11] : memref<256x128xf32, #tpu.memory_space<vmem>>, vector<256x128xf32>
      %c0_12 = arith.constant 0 : index
      %c0_13 = arith.constant 0 : index
      %13 = vector.load %arg5[%c0_12, %c0_13] : memref<1x128xf32, #tpu.memory_space<vmem>>, vector<1x128xf32>
      %14 = vector.broadcast %13 : vector<1x128xf32> to vector<256x128xf32>
      %15 = arith.addf %12, %14 : vector<256x128xf32>
      %cst_14 = arith.constant 0.000000e+00 : f32
      %16 = vector.broadcast %cst_14 : f32 to vector<256x128xf32>
      %17 = arith.cmpf ogt, %15, %16 : vector<256x128xf32>
      %cst_15 = arith.constant 1.000000e-01 : f32
      %18 = vector.broadcast %cst_15 : f32 to vector<256x128xf32>
      %19 = arith.mulf %18, %15 : vector<256x128xf32>
      %20 = arith.select %17, %15, %19 : vector<256x128xi1>, vector<256x128xf32>
      %21 = arith.truncf %20 : vector<256x128xf32> to vector<256x128xbf16>
      %c0_16 = arith.constant 0 : index
      %c0_17 = arith.constant 0 : index
      %22 = vector.load %arg6[%c0_16, %c0_17] : memref<256x128xbf16, #tpu.memory_space<vmem>>, vector<256x128xbf16>
      tpu.vector_store %arg6[%c0_16, %c0_17], %21 {strides = array<i32>} : memref<256x128xbf16, #tpu.memory_space<vmem>>, vector<256x128xbf16>,
    } else {
    }
    return
  }
  func.func @transform_0(%arg0: i32, %arg1: i32, %arg2: i32) -> (i32, i32) {
    %c0_i32 = arith.constant 0 : i32
    return %arg0, %arg2 : i32, i32
  }
  func.func @transform_1(%arg0: i32, %arg1: i32, %arg2: i32) -> (i32, i32) {
    %c0_i32 = arith.constant 0 : i32
    return %arg2, %arg1 : i32, i32
  }
  func.func @transform_2(%arg0: i32, %arg1: i32, %arg2: i32) -> (i32, i32) {
    %c0_i32 = arith.constant 0 : i32
    %c0_i32_0 = arith.constant 0 : i32
    return %c0_i32, %arg1 : i32, i32
  }
  func.func @transform_3(%arg0: i32, %arg1: i32, %arg2: i32) -> (i32, i32) {
    %c0_i32 = arith.constant 0 : i32
    return %arg0, %arg1 : i32, i32
  }
}

</mosaic_0001>

<bundles_post_ra>
// kernel: conv_block.1
= control target key start
LH: loop header
LB: loop body
LE: loop exit
PB: predicated region body
PF: predicated region fallthrough
CT: control target
= control target key end

     0   :  { %8 = vsyncpa [#allocation4], 0  ;;  %s1884_s0 = inlined_call_operand.vmem [shape: bf16[2048,128], index: 0, kind: input, shape index: {}]   ;;  %s1885_s1 = inlined_call_operand.vmem [shape: bf16[128,128], index: 1, kind: input, shape index: {}]   ;;  %s1886_s2 = inlined_call_operand.vmem [shape: f32[1,128], index: 2, kind: input, shape index: {}]   ;;  %s1887_s3 = inlined_call_operand.hbm [shape: bf16[2048,128], index: 3, kind: output, shape index: {}]  }
   0x1   :  { %10 = vsyncpa [#allocation4 + $0x1], 0  ;;  %s1662_s12 = smov 0   ;;  %s1664_s13 = smov 0  }
   0x2   :  { %s1666_s14 = smov 0   ;;  %s1668_s15 = smov 0  }
   0x3   :  { %s1670_s16 = smov 0   ;;  %s1672_s17 = smov 0  }
   0x4 LB: > { %s1190_s18 = sadd.s32 4294967295, %s1637_s17   ;;  %s1191_s19 = sadd.s32 4294967294, %s1637_s17   ;;  %s1637_s17 = sphi %s1672_s17, %s16_s17   ;;  %s1633_s16 = sphi %s1670_s16, %s1894_s16   ;;  %s1629_s15 = sphi %s1668_s15, %s1893_s15   ;;  %s1625_s14 = sphi %s1666_s14, %s1892_s14   ;;  %s1621_s13 = sphi %s1664_s13, %s1891_s13   ;;  %s1617_s12 = sphi %s1662_s12, %s1890_s12  }
   0x5   : > { %s35_s20 = sadd.s32 1, %s1633_s16  ;;  %s126_s21 = sadd.s32 1, %s1625_s14 }
   0x6   : > { %p37_p0 = scmp.ge.s32.totalorder %s35_s20, 8  ;;  %p136_p1 = scmp.ne.s32.totalorder %s1625_s14, %s1621_s13 }
   0x7   : > { %p137_p2 = scmp.eq.s32.totalorder %s1190_s18, 7  ;;  %p142_p3 = scmp.ne.s32.totalorder %s1621_s13, %s1617_s12 }
   0x8   : > { %s1896_s20 = smov (%p37_p0, %s35_s20), 0  ;;  %p143_p5 = scmp.eq.s32.totalorder %s1191_s19, 7 }
   0x9   : > { %p1702_p4 = por %p137_p2, %p136_p1  ;;  %s121_s23 = ssub.s32 %s1633_s16, %s1896_s20 }
   0xa   : > { %p1196_p6 = scmp.ge.s32.totalorder %s1637_s17, 1  ;;  %p124_p7 = scmp.eq.s32.totalorder %s121_s23, 0 }
   0xb   : > { %p1709_p8 = por %p143_p5, %p142_p3  ;;  %p191_p9 = scmp.lt.s32.totalorder %s1637_s17, 9 }
   0xc   : > { %s1715_s25 = scalar_select %p124_p7, %s1625_s14, %s126_s21  }
   0xd   : > { %p192_p10 = pnand %p1196_p6, %p191_p9 }
   0xe   : > { %v1535_v0 = vld [vmem:[%s1885_s1] sm:$0xff] (!%p192_p10)   ;;  %s1198_s28 = sshll.u32 (!%p192_p10), %s1629_s15, 5  ;;  %v1536_v1 = vld [vmem:[%s1885_s1 + $0x8] sm:$0xff] (!%p192_p10)   ;;  %v1537_v2 = vld [vmem:[%s1885_s1 + $0x10] sm:$0xff] (!%p192_p10)   ;;  %s226_s5 = sand.u32 (!%p192_p10), 1, %s1621_s13  }
   0xf   : > { %195 = sbr.rel (%p192_p10) target bundleno = 316 (0x13c), region = 32  ;;  %p230_p11 = scmp.lt.s32.totalorder (!%p192_p10), %s1198_s28, 255  ;;  %1414 = vmatprep.subr.bf16.mxu0 (!%p192_p10), %v1535_v0  ;;  %1462 = vmatprep.subr.bf16.mxu1 (!%p192_p10), %v1535_v0  ;;  %v1538_v3 = vld [vmem:[%s1885_s1 + $0x18] sm:$0xff] (!%p192_p10)   ;;  %v1539_v6 = vld [vmem:[%s1885_s1 + $0x20] sm:$0xff] (!%p192_p10)   ;;  %v1540_v7 = vld [vmem:[%s1885_s1 + $0x28] sm:$0xff] (!%p192_p10)  }
  0x10   : > { %1415 = vmatpush3.bf16.msra.mxu0 (!%p192_p10), %v1535_v0  ;;  %1470 = vmatpush3.bf16.msra.mxu1 (!%p192_p10), %v1535_v0  ;;  %v1541_v8 = vld [vmem:[%s1885_s1 + $0x30] sm:$0xff] (!%p192_p10)   ;;  %v1542_v9 = vld [vmem:[%s1885_s1 + $0x38] sm:$0xff] (!%p192_p10)   ;;  %v1766_v24 = vld [vmem:[%s1886_s2] ss:$0 sm:$0xff] (!%p192_p10)  ;;  %s1294_s8 = sshll.u32 (!%p192_p10), %s1629_s15, 11  ;;  %s1838_s15 = scalar_lea.sflag (!%p192_p10), [#allocation4], %s226_s5 }
  0x11   : > { %1416 = vmatprep.subr.bf16.mxu0 (!%p192_p10), %v1536_v1  ;;  %1463 = vmatprep.subr.bf16.mxu1 (!%p192_p10), %v1536_v1  ;;  %s1831_s18 = scalar_lea.hbm (!%p192_p10), %s1887_s3, %s1294_s8  ;;  %s1639_s21 = smov (!%p192_p10), [#allocation3]  }
  0x12   : > { %s1563_s23 = sshll.u32 (!%p192_p10), %s1639_s21, 4  ;;  %s1564_s23 = int_to_ptr.vmem [resolvable:$false] %s1563_s23 }
  0x13   : > { %s1565_s26 = scalar_lea.vmem (!%p192_p10), %s1564_s23, 4096 }
  0x14   : > { %1417 = vmatpush3.bf16.msra.mxu0 (!%p192_p10), %v1536_v1  ;;  %1471 = vmatpush3.bf16.msra.mxu1 (!%p192_p10), %v1536_v1 }
  0x15   : > { %1418 = vmatprep.subr.bf16.mxu0 (!%p192_p10), %v1537_v2  ;;  %1464 = vmatprep.subr.bf16.mxu1 (!%p192_p10), %v1537_v2 }
  0x16   : > { %s1898_s28 = smov (!%p230_p11, %s1198_s28), 255 }
  0x17   : > { %s1199_s6 = sshll.u32 %s1898_s28, 2 }
  0x18   : > { %s1730_s9 = scalar_lea.vmem %s1884_s0, %s1199_s6  ;;  %1419 = vmatpush3.bf16.msra.mxu0 %v1537_v2  ;;  %1472 = vmatpush3.bf16.msra.mxu1 %v1537_v2  ;;  %s1197_s6 = sshll.u32 %s226_s5, 7 }
  0x19   : > { %v1543_v4 = vld [vmem:[%s1730_s9] sm:$0xff]   ;;  %1420 = vmatprep.subr.bf16.mxu0 %v1538_v3  ;;  %1465 = vmatprep.subr.bf16.mxu1 %v1538_v3  ;;  %v1545_v10 = vld [vmem:[%s1730_s9 + $0x8] sm:$0xff]   ;;  %v1547_v12 = vld [vmem:[%s1730_s9 + $0x10] sm:$0xff]   ;;  %s1783_s7 = scalar_lea.vmem [#allocation3], %s1197_s6 }
  0x1a   : > { %v1544_v5 = vld [vmem:[%s1730_s9 + $0x40] sm:$0xff]   ;;  %1430 = vmatprep.mubr.bf16.mxu0 %v1543_v4  ;;  %v1546_v11 = vld [vmem:[%s1730_s9 + $0x48] sm:$0xff]   ;;  %v1548_v13 = vld [vmem:[%s1730_s9 + $0x50] sm:$0xff]  }
  0x1b   : > { %1446 = vmatprep.mubr.bf16.mxu1 %v1544_v5  ;;  %v1549_v14 = vld [vmem:[%s1730_s9 + $0x18] sm:$0xff]   ;;  %v1551_v16 = vld [vmem:[%s1730_s9 + $0x20] sm:$0xff]   ;;  %v1553_v18 = vld [vmem:[%s1730_s9 + $0x28] sm:$0xff]  }
  0x1c   : > { %1421 = vmatpush3.bf16.msra.mxu0 %v1538_v3  ;;  %1473 = vmatpush3.bf16.msra.mxu1 %v1538_v3  ;;  %v1550_v15 = vld [vmem:[%s1730_s9 + $0x58] sm:$0xff]   ;;  %v1552_v17 = vld [vmem:[%s1730_s9 + $0x60] sm:$0xff]   ;;  %v1554_v19 = vld [vmem:[%s1730_s9 + $0x68] sm:$0xff]  }
  0x1d   : > { %1422 = vmatprep.subr.bf16.mxu0 %v1539_v6  ;;  %1466 = vmatprep.subr.bf16.mxu1 %v1539_v6  ;;  %v1555_v20 = vld [vmem:[%s1730_s9 + $0x30] sm:$0xff]   ;;  %v1557_v22 = vld [vmem:[%s1730_s9 + $0x38] sm:$0xff]  }
  0x1e   : > { %v1556_v21 = vld [vmem:[%s1730_s9 + $0x70] sm:$0xff]   ;;  %v1558_v23 = vld [vmem:[%s1730_s9 + $0x78] sm:$0xff]   ;;  %s1082_s9 = sshll.u32 %s1783_s7, 4  ;;  %s1833_s9 = int_to_ptr.vmem [resolvable:$true] %s1082_s9 }
  0x1f   : > { %s1559_s19 = scalar_lea.vmem %s1833_s9, 2048  ;;  %p1566_p1 = scmp.lt.s32.totalorder %s1833_s9, %s1564_s23 }
  0x20   : > { %1423 = vmatpush3.bf16.msra.mxu0 %v1539_v6  ;;  %1474 = vmatpush3.bf16.msra.mxu1 %v1539_v6  ;;  %p1560_p12 = scmp.ne.s32.totalorder %s1833_s9, %s1559_s19  ;;  %p1567_p2 = scmp.lt.s32.totalorder %s1565_s26, %s1559_s19 }
  0x21   : > { %1424 = vmatprep.subr.bf16.mxu0 %v1540_v7  ;;  %1467 = vmatprep.subr.bf16.mxu1 %v1540_v7 }
  0x22   : > { %p1561_p13 = pnand %p1560_p12, %p1702_p4  ;;  %p1568_p3 = por %p1567_p2, %p1566_p1 }
  0x24   : > { %1425 = vmatpush3.bf16.msra.mxu0 %v1540_v7  ;;  %1475 = vmatpush3.bf16.msra.mxu1 %v1540_v7  ;;  %p1562_p0 = pneg %p1561_p13 }
  0x25   : > { %1426 = vmatprep.subr.bf16.mxu0 %v1541_v8  ;;  %1468 = vmatprep.subr.bf16.mxu1 %v1541_v8 }
  0x26   : > { %p1569_p5 = pnand %p1568_p3, %p1562_p0 }
  0x28   : > { %1427 = vmatpush3.bf16.msra.mxu0 %v1541_v8  ;;  %1476 = vmatpush3.bf16.msra.mxu1 %v1541_v8 }
  0x29   : > { %1428 = vmatprep.subr.bf16.mxu0 %v1542_v9  ;;  %1469 = vmatprep.subr.bf16.mxu1 %v1542_v9 }
  0x2c   : > { %1429 = vmatpush3.bf16.msra.mxu0 %v1542_v9  ;;  %1477 = vmatpush3.bf16.msra.mxu1 %v1542_v9 }
  0x2f   : > { %1431 = vmatmul.mubr.bf16.vlgmr.msra.gmra.mrb[0].mxu0 %v1545_v10  ;;  %1447 = vmatmul.mubr.bf16.vlgmr.msra.gmra.mrb[0].mxu1 %v1546_v11 }
  0x30   : > { %1434 = vmatprep.mubr.bf16.mxu0 %v1547_v12  ;;  %1450 = vmatprep.mubr.bf16.mxu1 %v1548_v13 }
  0x37   : > { %1435 = vmatmul.mubr.bf16.gmra.mrb[4].mxu0 %v1549_v14  ;;  %1451 = vmatmul.mubr.bf16.gmra.mrb[4].mxu1 %v1550_v15 }
  0x38   : > { %1438 = vmatprep.mubr.bf16.mxu0 %v1551_v16  ;;  %1454 = vmatprep.mubr.bf16.mxu1 %v1552_v17 }
  0x3f   : > { %1439 = vmatmul.mubr.bf16.gmra.mrb[8].mxu0 %v1553_v18  ;;  %1455 = vmatmul.mubr.bf16.gmra.mrb[8].mxu1 %v1554_v19 }
  0x40   : > { %1442 = vmatprep.mubr.bf16.mxu0 %v1555_v20  ;;  %1458 = vmatprep.mubr.bf16.mxu1 %v1556_v21 }
  0x47   : > { %1443 = vmatmul.mubr.bf16.gmra.mrb[12].mxu0 %v1557_v22  ;;  %1459 = vmatmul.mubr.bf16.gmra.mrb[12].mxu1 %v1558_v23 }
 0x102   : > { %v1432_v25 = vpop.f32.mrb[0].mxu0  ;;  %v1448_v26 = vpop.f32.mrb[0].mxu1 }
 0x103   : > { %v781_v27 = vadd.f32 %v1432_v25, %v1766_v24  ;;  %v797_v28 = vadd.f32 %v1448_v26, %v1766_v24  ;;  %v546_v29 = vpop.f32.mrb[1].mxu0  ;;  %v610_v30 = vpop.f32.mrb[1].mxu1 }
 0x104   : > { %v779_v31 = vadd.f32 %v1766_v24, %v546_v29  ;;  %v795_v32 = vadd.f32 %v1766_v24, %v610_v30  ;;  %v1433_v33 = vpop.f32.mrb[2].mxu0  ;;  %v1449_v34 = vpop.f32.mrb[2].mxu1 }
 0x105   : > { %vm813_vm0 = vcmp.gt.f32.partialorder %v781_v27, 0.0  ;;  %v845_v35 = vmul.f32 0.1, %v781_v27  ;;  %vm829_vm1 = vcmp.gt.f32.partialorder %v797_v28, 0.0  ;;  %v861_v36 = vmul.f32 0.1, %v797_v28 }
 0x106   : > { %vm811_vm2 = vcmp.gt.f32.partialorder %v779_v31, 0.0  ;;  %v843_v37 = vmul.f32 0.1, %v779_v31  ;;  %vm827_vm3 = vcmp.gt.f32.partialorder %v795_v32, 0.0  ;;  %v859_v38 = vmul.f32 0.1, %v795_v32 }
 0x107   : > { %v782_v39 = vadd.f32 %v1433_v33, %v1766_v24  ;;  %v798_v40 = vadd.f32 %v1449_v34, %v1766_v24  ;;  %v549_v41 = vpop.f32.mrb[3].mxu0  ;;  %v613_v42 = vpop.f32.mrb[3].mxu1  ;;  %v877_v43 = vsel %vm813_vm0, %v781_v27, %v845_v35  ;;  %v893_v44 = vsel %vm829_vm1, %v797_v28, %v861_v36 }
 0x108   : > { %v780_v45 = vadd.f32 %v1766_v24, %v549_v41  ;;  %v796_v46 = vadd.f32 %v1766_v24, %v613_v42  ;;  %v875_v51 = vsel %vm811_vm2, %v779_v31, %v843_v37  ;;  %v891_v52 = vsel %vm827_vm3, %v795_v32, %v859_v38 }
 0x109   : > { %vm814_vm4 = vcmp.gt.f32.partialorder %v782_v39, 0.0  ;;  %v846_v47 = vmul.f32 0.1, %v782_v39  ;;  %vm830_vm5 = vcmp.gt.f32.partialorder %v798_v40, 0.0  ;;  %v862_v48 = vmul.f32 0.1, %v798_v40 }
 0x10a   : > { %vm812_vm6 = vcmp.gt.f32.partialorder %v780_v45, 0.0  ;;  %v844_v49 = vmul.f32 0.1, %v780_v45  ;;  %vm828_vm7 = vcmp.gt.f32.partialorder %v796_v46, 0.0  ;;  %v860_v50 = vmul.f32 0.1, %v796_v46 }
 0x10b   : > { %v878_v53 = vsel %vm814_vm4, %v782_v39, %v846_v47  ;;  %v894_v54 = vsel %vm830_vm5, %v798_v40, %v862_v48  ;;  %v1436_v55 = vpop.f32.mrb[4].mxu0  ;;  %v1452_v56 = vpop.f32.mrb[4].mxu1 }
 0x10c   : > { %v1303_v57 = vpack.c.bf16 %v878_v53, %v877_v43  ;;  %v1343_v58 = vpack.c.bf16 %v894_v54, %v893_v44  ;;  %v876_v59 = vsel %vm812_vm6, %v780_v45, %v844_v49  ;;  %v892_v60 = vsel %vm828_vm7, %v796_v46, %v860_v50  ;;  %v562_v61 = vpop.f32.mrb[5].mxu0  ;;  %v626_v62 = vpop.f32.mrb[5].mxu1 }
 0x10d   : > { %v1298_v63 = vpack.c.bf16 %v876_v59, %v875_v51  ;;  %v1338_v0 = vpack.c.bf16 %v892_v60, %v891_v52  ;;  %v785_v1 = vadd.f32 %v1436_v55, %v1766_v24  ;;  %v801_v2 = vadd.f32 %v1452_v56, %v1766_v24  ;;  %v1437_v3 = vpop.f32.mrb[6].mxu0  ;;  %v1453_v4 = vpop.f32.mrb[6].mxu1 }
 0x10e   : > { %1375 = vst [vmem:[%s1783_s7 + $0x8] sm:$0xff] %v1303_v57   ;;  %1383 = vst [vmem:[%s1783_s7 + $0x48] sm:$0xff] %v1343_v58   ;;  %v783_v5 = vadd.f32 %v1766_v24, %v562_v61  ;;  %v799_v6 = vadd.f32 %v1766_v24, %v626_v62  ;;  %v786_v7 = vadd.f32 %v1437_v3, %v1766_v24  ;;  %v565_v9 = vpop.f32.mrb[7].mxu0  ;;  %v629_v10 = vpop.f32.mrb[7].mxu1 }
 0x10f   : > { %v802_v8 = vadd.f32 %v1453_v4, %v1766_v24  ;;  %1299 = vst [vmem:[%s1783_s7] sm:$0xff] %v1298_v63   ;;  %1382 = vst [vmem:[%s1783_s7 + $0x40] sm:$0xff] %v1338_v0   ;;  %vm817_vm8 = vcmp.gt.f32.partialorder %v785_v1, 0.0  ;;  %v849_v11 = vmul.f32 0.1, %v785_v1  ;;  %vm833_vm9 = vcmp.gt.f32.partialorder %v801_v2, 0.0 }
 0x110   : > { %v865_v12 = vmul.f32 0.1, %v801_v2  ;;  %vm815_vm10 = vcmp.gt.f32.partialorder %v783_v5, 0.0  ;;  %v847_v13 = vmul.f32 0.1, %v783_v5  ;;  %vm831_vm11 = vcmp.gt.f32.partialorder %v799_v6, 0.0 }
 0x111   : > { %v881_v14 = vsel %vm817_vm8, %v785_v1, %v849_v11  ;;  %v863_v15 = vmul.f32 0.1, %v799_v6  ;;  %vm818_vm12 = vcmp.gt.f32.partialorder %v786_v7, 0.0  ;;  %v850_v16 = vmul.f32 0.1, %v786_v7 }
 0x112   : > { %v897_v17 = vsel %vm833_vm9, %v801_v2, %v865_v12  ;;  %v879_v18 = vsel %vm815_vm10, %v783_v5, %v847_v13  ;;  %vm834_vm13 = vcmp.gt.f32.partialorder %v802_v8, 0.0  ;;  %v866_v19 = vmul.f32 0.1, %v802_v8  ;;  %v1440_v20 = vpop.f32.mrb[8].mxu0  ;;  %v1456_v21 = vpop.f32.mrb[8].mxu1 }
 0x113   : > { %v882_v22 = vsel %vm818_vm12, %v786_v7, %v850_v16  ;;  %v784_v23 = vadd.f32 %v1766_v24, %v565_v9  ;;  %v800_v25 = vadd.f32 %v1766_v24, %v629_v10  ;;  %v789_v26 = vadd.f32 %v1440_v20, %v1766_v24  ;;  %v578_v27 = vpop.f32.mrb[9].mxu0  ;;  %v642_v28 = vpop.f32.mrb[9].mxu1 }
 0x114   : > { %v1313_v29 = vpack.c.bf16 %v882_v22, %v881_v14  ;;  %v898_v30 = vsel %vm834_vm13, %v802_v8, %v866_v19  ;;  %v805_v31 = vadd.f32 %v1456_v21, %v1766_v24  ;;  %v787_v32 = vadd.f32 %v1766_v24, %v578_v27  ;;  %v1441_v33 = vpop.f32.mrb[10].mxu0  ;;  %v1457_v34 = vpop.f32.mrb[10].mxu1 }
 0x115   : > { %v1353_v35 = vpack.c.bf16 %v898_v30, %v897_v17  ;;  %vm816_vm14 = vcmp.gt.f32.partialorder %v784_v23, 0.0  ;;  %v848_v36 = vmul.f32 0.1, %v784_v23  ;;  %vm832_vm15 = vcmp.gt.f32.partialorder %v800_v25, 0.0  ;;  %v581_v37 = vpop.f32.mrb[11].mxu0  ;;  %v645_v38 = vpop.f32.mrb[11].mxu1 }
 0x116   : > { %1377 = vst [vmem:[%s1783_s7 + $0x18] sm:$0xff] %v1313_v29   ;;  %v864_v39 = vmul.f32 0.1, %v800_v25  ;;  %vm821_vm0 = vcmp.gt.f32.partialorder %v789_v26, 0.0  ;;  %v853_v40 = vmul.f32 0.1, %v789_v26  ;;  %v895_v41 = vsel %vm831_vm11, %v799_v6, %v863_v15 }
 0x117   : > { %vm837_vm1 = vcmp.gt.f32.partialorder %v805_v31, 0.0  ;;  %1385 = vst [vmem:[%s1783_s7 + $0x58] sm:$0xff] %v1353_v35   ;;  %v880_v42 = vsel %vm816_vm14, %v784_v23, %v848_v36  ;;  %v869_v43 = vmul.f32 0.1, %v805_v31  ;;  %vm819_vm2 = vcmp.gt.f32.partialorder %v787_v32, 0.0 }
 0x118   : > { %v1308_v44 = vpack.c.bf16 %v880_v42, %v879_v18  ;;  %v896_v45 = vsel %vm832_vm15, %v800_v25, %v864_v39  ;;  %v851_v46 = vmul.f32 0.1, %v787_v32  ;;  %v803_v47 = vadd.f32 %v1766_v24, %v642_v28 }
 0x119   : > { %v1348_v48 = vpack.c.bf16 %v896_v45, %v895_v41  ;;  %v885_v49 = vsel %vm821_vm0, %v789_v26, %v853_v40  ;;  %v901_v50 = vsel %vm837_vm1, %v805_v31, %v869_v43  ;;  %v790_v51 = vadd.f32 %v1441_v33, %v1766_v24 }
 0x11a   : > { %1376 = vst [vmem:[%s1783_s7 + $0x10] sm:$0xff] %v1308_v44   ;;  %vm835_vm3 = vcmp.gt.f32.partialorder %v803_v47, 0.0  ;;  %v867_v52 = vmul.f32 0.1, %v803_v47  ;;  %v806_v53 = vadd.f32 %v1457_v34, %v1766_v24  ;;  %v788_v54 = vadd.f32 %v1766_v24, %v581_v37  ;;  %v1444_v55 = vpop.f32.mrb[12].mxu0  ;;  %v1460_v56 = vpop.f32.mrb[12].mxu1 }
 0x11b   : > { %1384 = vst [vmem:[%s1783_s7 + $0x50] sm:$0xff] %v1348_v48   ;;  %vm822_vm4 = vcmp.gt.f32.partialorder %v790_v51, 0.0  ;;  %v854_v57 = vmul.f32 0.1, %v790_v51  ;;  %v804_v58 = vadd.f32 %v1766_v24, %v645_v38  ;;  %v793_v59 = vadd.f32 %v1444_v55, %v1766_v24  ;;  %v594_v60 = vpop.f32.mrb[13].mxu0  ;;  %v658_v61 = vpop.f32.mrb[13].mxu1 }
 0x11c   : > { %v883_v62 = vsel %vm819_vm2, %v787_v32, %v851_v46  ;;  %vm838_vm5 = vcmp.gt.f32.partialorder %v806_v53, 0.0  ;;  %v870_v63 = vmul.f32 0.1, %v806_v53  ;;  %vm820_vm6 = vcmp.gt.f32.partialorder %v788_v54, 0.0  ;;  %v1445_v0 = vpop.f32.mrb[14].mxu0  ;;  %v1461_v1 = vpop.f32.mrb[14].mxu1 }
 0x11d   : > { %v886_v2 = vsel %vm822_vm4, %v790_v51, %v854_v57  ;;  %v852_v3 = vmul.f32 0.1, %v788_v54  ;;  %vm836_vm7 = vcmp.gt.f32.partialorder %v804_v58, 0.0  ;;  %v868_v4 = vmul.f32 0.1, %v804_v58  ;;  %v597_v5 = vpop.f32.mrb[15].mxu0 }
 0x11e   : > { %v899_v6 = vsel %vm835_vm3, %v803_v47, %v867_v52  ;;  %v1323_v7 = vpack.c.bf16 %v886_v2, %v885_v49  ;;  %v902_v8 = vsel %vm838_vm5, %v806_v53, %v870_v63  ;;  %v857_v9 = vmul.f32 0.1, %v793_v59  ;;  %v661_v10 = vpop.f32.mrb[15].mxu1 }
 0x11f   : > { %v1363_v11 = vpack.c.bf16 %v902_v8, %v901_v50  ;;  %v884_v12 = vsel %vm820_vm6, %v788_v54, %v852_v3  ;;  %v900_v13 = vsel %vm836_vm7, %v804_v58, %v868_v4  ;;  %v809_v14 = vadd.f32 %v1460_v56, %v1766_v24 }
 0x120   : > { %1379 = vst [vmem:[%s1783_s7 + $0x28] sm:$0xff] %v1323_v7   ;;  %v1318_v15 = vpack.c.bf16 %v884_v12, %v883_v62  ;;  %v1358_v16 = vpack.c.bf16 %v900_v13, %v899_v6  ;;  %vm825_vm8 = vcmp.gt.f32.partialorder %v793_v59, 0.0  ;;  %v791_v17 = vadd.f32 %v1766_v24, %v594_v60 }
 0x121   : > { %1387 = vst [vmem:[%s1783_s7 + $0x68] sm:$0xff] %v1363_v11   ;;  %vm841_vm9 = vcmp.gt.f32.partialorder %v809_v14, 0.0  ;;  %v873_v18 = vmul.f32 0.1, %v809_v14  ;;  %v807_v19 = vadd.f32 %v1766_v24, %v658_v61  ;;  %v794_v20 = vadd.f32 %v1445_v0, %v1766_v24 }
 0x122   : > { %1378 = vst [vmem:[%s1783_s7 + $0x20] sm:$0xff] %v1318_v15   ;;  %1386 = vst [vmem:[%s1783_s7 + $0x60] sm:$0xff] %v1358_v16   ;;  %v855_v21 = vmul.f32 0.1, %v791_v17  ;;  %v810_v22 = vadd.f32 %v1461_v1, %v1766_v24  ;;  %v792_v23 = vadd.f32 %v1766_v24, %v597_v5  ;;  %v889_v25 = vsel %vm825_vm8, %v793_v59, %v857_v9 }
 0x123   : > { %vm823_vm10 = vcmp.gt.f32.partialorder %v791_v17, 0.0  ;;  %vm826_vm11 = vcmp.gt.f32.partialorder %v794_v20, 0.0  ;;  %v905_v26 = vsel %vm841_vm9, %v809_v14, %v873_v18  ;;  %v858_v27 = vmul.f32 0.1, %v794_v20 }
 0x124   : > { %vm842_vm12 = vcmp.gt.f32.partialorder %v810_v22, 0.0  ;;  %v874_v28 = vmul.f32 0.1, %v810_v22  ;;  %vm839_vm13 = vcmp.gt.f32.partialorder %v807_v19, 0.0  ;;  %vm824_vm14 = vcmp.gt.f32.partialorder %v792_v23, 0.0 }
 0x125   : > { %v856_v29 = vmul.f32 0.1, %v792_v23  ;;  %v808_v30 = vadd.f32 %v1766_v24, %v661_v10  ;;  %v887_v31 = vsel %vm823_vm10, %v791_v17, %v855_v21  ;;  %v871_v32 = vmul.f32 0.1, %v807_v19 }
 0x126   : > { %v890_v33 = vsel %vm826_vm11, %v794_v20, %v858_v27  ;;  %v906_v34 = vsel %vm842_vm12, %v810_v22, %v874_v28 }
 0x127   : > { %v1333_v35 = vpack.c.bf16 %v890_v33, %v889_v25  ;;  %v1373_v36 = vpack.c.bf16 %v906_v34, %v905_v26  ;;  %v888_v37 = vsel %vm824_vm14, %v792_v23, %v856_v29  ;;  %vm840_vm15 = vcmp.gt.f32.partialorder %v808_v30, 0.0 }
 0x128   : > { %v1328_v38 = vpack.c.bf16 %v888_v37, %v887_v31  ;;  %v872_v39 = vmul.f32 0.1, %v808_v30  ;;  %v903_v24 = vsel %vm839_vm13, %v807_v19, %v871_v32 }
 0x129   : > { %1381 = vst [vmem:[%s1783_s7 + $0x38] sm:$0xff] %v1333_v35   ;;  %1389 = vst [vmem:[%s1783_s7 + $0x78] sm:$0xff] %v1373_v36  }
 0x12a   : > { %1380 = vst [vmem:[%s1783_s7 + $0x30] sm:$0xff] %v1328_v38   ;;  %v904_v40 = vsel %vm840_vm15, %v808_v30, %v872_v39 }
 0x12b   : > { %v1368_v41 = vpack.c.bf16 %v904_v40, %v903_v24 }
 0x12d   : > { %1388 = vst [vmem:[%s1783_s7 + $0x70] sm:$0xff] %v1368_v41  }
 0x12e   : > { %1572 = shalt.err (!%p1569_p5)
}
 0x12f   : > { %s1573_s27 = scalar_lea.hbm %s1831_s18, 2048  ;;  %s1577_s30 = scalar_lea.hbm %s1887_s3, 16384 }
 0x130   : > { %p1574_p6 = scmp.ne.s32.totalorder %s1831_s18, %s1573_s27  ;;  %p1578_p10 = scmp.lt.u32.totalorder %s1831_s18, %s1887_s3 }
 0x131   : > { %p1579_p11 = scmp.lt.u32.totalorder %s1577_s30, %s1573_s27  ;;  %p1581_p13 = scmp.lt.u32.totalorder %s1573_s27, %s1831_s18 }
 0x132   : > { %p1575_p7 = pnand %p1574_p6, %p1702_p4 }
 0x133   : > { %p1580_p12 = por %p1579_p11, %p1578_p10 }
 0x134   : > { %p1576_p9 = pneg %p1575_p7 }
 0x135   : > { %p1582_p0 = por %p1581_p13, %p1580_p12 }
 0x137   : > { %p1583_p1 = pnand %p1582_p0, %p1576_p9 }
 0x139   : > { %1586 = shalt.err (!%p1583_p1)
}
 0x13a   : > { %s1640_s6 = smov 64   ;;  %s1641_s7 = smov 4  }
 0x13b   : > { %1478 = dma.vmem_to_hbm [thread:$0]  (%p1702_p4), %s1833_s9, 2048, %s1831_s18, %s1838_s15, %s1640_s6, %s1640_s6, %s1641_s7  }
 0x13c PF: > { %p1484_p2 = scmp.ge.s32.totalorder %s1637_s17, 2  ;;  %s1097_s8 = sand.u32 1, %s1617_s12  }
 0x13d   : > { %s1098_s10 = scalar_lea.sflag [#allocation4], %s1097_s8 }
 0x13e   : > { %p1481_p3 = pnand %p1484_p2, %p1709_p8 }
 0x140   : > { %1612 = dma.done.wait (!%p1481_p3), %s1098_s10, 2048  }
 0x141   : > { %1614 = vsyncadd (!%p1481_p3), %s1098_s10, 4294965248  ;;  %s16_s17 = sadd.s32 1, %s1637_s17   ;;  %s1890_s12 = smov %s1621_s13 }
 0x142   : > { %p13_p5 = scmp.ge.s32.totalorder %s16_s17, 10   ;;  %s1891_s13 = smov %s1625_s14 }
 0x143   : > { %s1892_s14 = smov %s1715_s25  ;;  %s1893_s15 = smov %s1633_s16 }
 0x144   : > { %s1894_s16 = smov %s1896_s20  ;;  %15 = sbr.rel (!%p13_p5) target bundleno = 4 (0x4), region = 81 }
 0x14b   :  { %1103 = vsyncpa [#allocation4], 1 }
 0x14c   :  { %1105 = vsyncpa [#allocation4 + $0x1], 1 }

</bundles_post_ra>
